<compile_context>
chip_gen: v7x
topology: tpu7x:2x2x1
jax: 0.10.0
libtpu: 0.0.40
codegen_flags: <defaults>
</compile_context>

<pallas_src>
import jax
import jax.numpy as jnp
from jax.experimental import pallas as pl
from jax.experimental.pallas import tpu as pltpu

_LANE = 128
_WIDTH_CANDIDATES = (1024, 512, 256, 128)       # lane widths, widest first
_TARGET_TILE_BYTES = 4 * 1024 * 1024            # per-buffer tile target (~4 MiB)
_VMEM_LIMIT_BYTES = 32 * 1024 * 1024            # explicit scoped-VMEM budget


def _sublane_multiple(dtype) -> int:
    """Sublane alignment: 8 for 4-byte, 16 for 2-byte, 32 for 1-byte dtypes."""
    itemsize = jnp.dtype(dtype).itemsize
    return max(8, 32 // max(itemsize, 1))


def _asinh_literal(x: jax.Array) -> jax.Array:
    """Plain-jnp literal expression (used for ragged tails / tiny tensors)."""
    xf = x.astype(jnp.float32)
    return jnp.log(xf + jnp.sqrt(xf * xf + 1.0)).astype(x.dtype)


def _arsinh_kernel(x_ref, o_ref):
    # Literal reference expression: log(x + sqrt(x^2 + 1)).
    x = x_ref[...].astype(jnp.float32)
    o_ref[...] = jnp.log(x + jnp.sqrt(x * x + 1.0)).astype(o_ref.dtype)


def _run_kernel_2d(x2d: jax.Array) -> jax.Array:
    """Run the elementwise kernel over a (rows, width) lane-dense slab."""
    rows, width = x2d.shape
    dtype = x2d.dtype
    sub = _sublane_multiple(dtype)
    itemsize = jnp.dtype(dtype).itemsize

    # Largest tile within the per-buffer byte budget, aligned to the sublane multiple.
    block_rows = max(sub, (_TARGET_TILE_BYTES // (width * itemsize)) // sub * sub)
    block_rows = min(block_rows, rows)

    # Ensure >= 2 grid steps when possible so both v7x TensorCores get work
    # ("parallel" axis).  On single-TC chips this costs at most one extra step.
    if pl.cdiv(rows, block_rows) < 2 and rows >= 2 * sub:
        half = pl.cdiv(rows, 2)
        block_rows = min(rows, ((half + sub - 1) // sub) * sub)

    grid = (pl.cdiv(rows, block_rows),)

    return pl.pallas_call(
        _arsinh_kernel,
        out_shape=jax.ShapeDtypeStruct((rows, width), dtype),
        grid_spec=pltpu.PrefetchScalarGridSpec(
            num_scalar_prefetch=0,
            grid=grid,
            in_specs=[pl.BlockSpec((block_rows, width), lambda i: (i, 0))],
            out_specs=pl.BlockSpec((block_rows, width), lambda i: (i, 0)),
        ),
        compiler_params=pltpu.CompilerParams(
            dimension_semantics=("parallel",),
            vmem_limit_bytes=_VMEM_LIMIT_BYTES,
        ),
    )(x2d)


def arsinh(x: jax.Array) -> jax.Array:
    """Elementwise log(x + sqrt(x^2 + 1)); same shape/dtype as the input."""
    orig_shape = x.shape
    n = x.size
    if n == 0:
        return x

    x_flat = jnp.reshape(x, (-1,))          # free for contiguous inputs
    sub = _sublane_multiple(x.dtype)

    # Pick the widest lane width whose aligned chunk divides n exactly (zero-copy
    # path); otherwise the widest width that still leaves a nonzero aligned bulk.
    width = None
    for cand in _WIDTH_CANDIDATES:
        if n % (cand * sub) == 0:
            width = cand
            break
    if width is None:
        for cand in _WIDTH_CANDIDATES:
            if n >= cand * sub:
                width = cand
                break
    if width is None:
        # Tensor smaller than one aligned chunk: plain jnp is cheaper than a kernel.
        return jnp.reshape(_asinh_literal(x_flat), orig_shape)

    chunk = width * sub
    n_bulk = (n // chunk) * chunk

    bulk2d = jnp.reshape(x_flat[:n_bulk], (n_bulk // width, width))
    out_bulk_flat = jnp.reshape(_run_kernel_2d(bulk2d), (-1,))

    if n_bulk == n:
        # Exact fit: no pad, no slice, no concat.
        return jnp.reshape(out_bulk_flat, orig_shape)

    # Ragged tail (< one chunk): handle with plain jnp instead of padding the
    # whole array and slicing it back (avoids full-array pad/slice copies).
    tail_out = _asinh_literal(x_flat[n_bulk:])
    out_flat = jnp.concatenate([out_bulk_flat, tail_out])
    return jnp.reshape(out_flat, orig_shape)


if __name__ == "__main__":
    key = jax.random.PRNGKey(0)

    # NCHW input consistent with a conv-net activation: batch=2, channels=4, 16x16.
    x = jax.random.normal(key, (2, 4, 16, 16), dtype=jnp.float32) * 3.0
    y = arsinh(x)
    jax.block_until_ready(y)
    y_ref = jnp.log(x + jnp.sqrt(x * x + 1.0))
    assert y.shape == x.shape and y.dtype == x.dtype
    assert jnp.allclose(y, y_ref, atol=1e-5, rtol=1e-5)

    # Ragged size: exercises the kernel-bulk + jnp-tail path.
    x2 = jax.random.normal(jax.random.PRNGKey(1), (3, 5, 17, 13), dtype=jnp.float32) * 2.0
    y2 = arsinh(x2)
    jax.block_until_ready(y2)
    y2_ref = jnp.log(x2 + jnp.sqrt(x2 * x2 + 1.0))
    assert jnp.allclose(y2, y2_ref, atol=1e-5, rtol=1e-5)

    # bf16 input: exercises dtype-aware (16-row) alignment and f32 in-kernel math.
    x3 = (jax.random.normal(jax.random.PRNGKey(2), (4, 8, 16, 16), dtype=jnp.float32) * 3.0
          ).astype(jnp.bfloat16)
    y3 = arsinh(x3)
    jax.block_until_ready(y3)
    x3f = x3.astype(jnp.float32)
    y3_ref = jnp.log(x3f + jnp.sqrt(x3f * x3f + 1.0)).astype(jnp.bfloat16)
    assert y3.dtype == jnp.bfloat16
    assert jnp.allclose(y3.astype(jnp.float32), y3_ref.astype(jnp.float32),
                        atol=2e-2, rtol=2e-2)

    # Larger aligned case: exercises a multi-step grid (>= 2 parallel steps).
    x4 = jax.random.normal(jax.random.PRNGKey(3), (1, 4, 64, 64), dtype=jnp.float32)
    y4 = arsinh(x4)
    jax.block_until_ready(y4)
    y4_ref = jnp.log(x4 + jnp.sqrt(x4 * x4 + 1.0))
    assert jnp.allclose(y4, y4_ref, atol=1e-5, rtol=1e-5)

    print("KERNEL_OK")
</pallas_src>

<mosaic_0001>
module attributes {stable_mosaic.version = 11 : i64} {
  func.func @_arsinh_kernel(%arg0: i32, %arg1: memref<8x256xf32, #tpu.memory_space<vmem>>, %arg2: memref<8x256xf32, #tpu.memory_space<vmem>>) attributes {dimension_semantics = [#tpu.dimension_semantics<parallel>], iteration_bounds = array<i64: 1>, scalar_prefetch = 0 : i64, scratch_operands = 0 : i64, tpu.core_type = #tpu.core_type<tc>, window_params = [{transform_indices = @transform_0, window_bounds = array<i64: 8, 256>}, {transform_indices = @transform_1, window_bounds = array<i64: 8, 256>}]} {
    %c0 = arith.constant 0 : index
    %c0_0 = arith.constant 0 : index
    %0 = vector.load %arg1[%c0, %c0_0] : memref<8x256xf32, #tpu.memory_space<vmem>>, vector<8x256xf32>
    %1 = arith.mulf %0, %0 : vector<8x256xf32>
    %cst = arith.constant 1.000000e+00 : f32
    %2 = vector.broadcast %cst : f32 to vector<8x256xf32>
    %3 = arith.addf %1, %2 : vector<8x256xf32>
    %4 = math.sqrt %3 : vector<8x256xf32>
    %5 = arith.addf %0, %4 : vector<8x256xf32>
    %6 = math.log %5 : vector<8x256xf32>
    %c0_1 = arith.constant 0 : index
    %c0_2 = arith.constant 0 : index
    %7 = vector.load %arg2[%c0_1, %c0_2] : memref<8x256xf32, #tpu.memory_space<vmem>>, vector<8x256xf32>
    tpu.vector_store %arg2[%c0_1, %c0_2], %6 {strides = array<i32>} : memref<8x256xf32, #tpu.memory_space<vmem>>, vector<8x256xf32>,
    return
  }
  func.func @transform_0(%arg0: i32) -> (i32, i32) {
    %c0_i32 = arith.constant 0 : i32
    %c0_i32_0 = arith.constant 0 : i32
    return %arg0, %c0_i32 : i32, i32
  }
  func.func @transform_1(%arg0: i32) -> (i32, i32) {
    %c0_i32 = arith.constant 0 : i32
    %c0_i32_0 = arith.constant 0 : i32
    return %arg0, %c0_i32 : i32, i32
  }
}

</mosaic_0001>

<bundles_post_ra>
// kernel: tpu_custom_call.1
= control target key start
LH: loop header
LB: loop body
LE: loop exit
PB: predicated region body
PF: predicated region fallthrough
CT: control target
= control target key end

     0   :  { %6 = vsyncpa [#allocation3], 0  ;;  %s158_s0 = inlined_call_operand.hbm [shape: f32[8,256], index: 0, kind: input, shape index: {}]   ;;  %s159_s1 = inlined_call_operand.hbm [shape: f32[8,256], index: 1, kind: output, shape index: {}]  }
   0x1   :  { %7 = vsyncpa [#allocation4], 0  ;;  %s122_s6 = smov [#allocation2]   ;;  %s74_s10 = scalar_lea.hbm %s158_s0, 256 }
   0x2   :  { %s14_s7 = sshll.u32 %s122_s6, 4  ;;  %p75_p0 = scmp.ne.s32.totalorder %s158_s0, %s74_s10  ;;  %s15_s7 = int_to_ptr.vmem [resolvable:$true] %s14_s7 }
   0x3   :  { %p78_p1 = scmp.lt.u32.totalorder %s74_s10, %s158_s0 }
   0x5   :  { %p80_p2 = pnand %p78_p1, %p75_p0 }
   0x7   :  { %83 = shalt.err (!%p80_p2)
}
   0x8   :  { %s84_s15 = scalar_lea.vmem %s15_s7, 256  ;;  %p89_p4 = scmp.lt.s32.totalorder %s15_s7, %s15_s7 }
   0x9   :  { %p85_p3 = scmp.ne.s32.totalorder %s15_s7, %s84_s15  ;;  %p90_p5 = scmp.lt.s32.totalorder %s84_s15, %s84_s15 }
   0xb   :  { %p91_p6 = por %p90_p5, %p89_p4 }
   0xd   :  { %p92_p7 = pnand %p91_p6, %p85_p3 }
   0xf   :  { %95 = shalt.err (!%p92_p7)
}
  0x10   :  { %17 = dma.hbm_to_vmem [thread:$0]  %s158_s0, 256, %s15_s7, [#allocation3]  }
  0x11   :  { %118 = dma.done.wait [#allocation3], 256  }
  0x12   :  { %119 = vsyncadd [#allocation3], 4294967040  ;;  %v21_v0 = vld [vmem:[#allocation2] sm:$0xff]  ;;  %v22_v1 = vld [vmem:[#allocation2 + $0x8] sm:$0xff]  ;;  %s123_s0 = smov [#allocation5]  }
  0x13   :  { %v23_v2 = vmul.f32 %v21_v0, %v21_v0  ;;  %v24_v3 = vmul.f32 %v22_v1, %v22_v1  ;;  %s55_s18 = sshll.u32 %s123_s0, 4  ;;  %s56_s18 = int_to_ptr.vmem [resolvable:$true] %s55_s18 }
  0x14   :  { %s96_s19 = scalar_lea.vmem %s56_s18, 256  ;;  %p101_p9 = scmp.lt.s32.totalorder %s56_s18, %s56_s18 }
  0x15   :  { %v25_v4 = vadd.f32 1.0, %v23_v2  ;;  %v26_v5 = vadd.f32 1.0, %v24_v3  ;;  %p97_p8 = scmp.ne.s32.totalorder %s56_s18, %s96_s19  ;;  %p102_p10 = scmp.lt.s32.totalorder %s96_s19, %s96_s19 }
  0x17   :  { %66 = vrsqrt.f32 %v25_v4  ;;  %vm29_vm0 = vcmp.eq.f32.partialorder %v25_v4, inf  ;;  %v32_v7 = vand.u32 2147483648, %v25_v4  ;;  %vm31_vm1 = vcmp.eq.f32.partialorder %v25_v4, 0.0  ;;  %p103_p11 = por %p102_p10, %p101_p9 }
  0x18   :  { %68 = vrsqrt.f32 %v26_v5  ;;  %vm36_vm2 = vcmp.eq.f32.partialorder %v26_v5, inf  ;;  %v39_v10 = vand.u32 2147483648, %v26_v5  ;;  %vm38_vm3 = vcmp.eq.f32.partialorder %v26_v5, 0.0 }
  0x19   :  { %p104_p12 = pnand %p103_p11, %p97_p8 }
  0x21   :  { %v67_v6 = vpop.eup %66 }
  0x22   :  { %v69_v8 = vpop.eup %68  ;;  %v28_v9 = vmul.f32 %v67_v6, %v25_v4 }
  0x23   :  { %v35_v11 = vmul.f32 %v69_v8, %v26_v5 }
  0x24   :  { %v30_v12 = vsel %vm29_vm0, %v25_v4, %v28_v9 }
  0x25   :  { %v33_v13 = vsel %vm31_vm1, %v32_v7, %v30_v12  ;;  %v37_v14 = vsel %vm36_vm2, %v26_v5, %v35_v11 }
  0x26   :  { %v41_v15 = vadd.f32 %v33_v13, %v21_v0  ;;  %v40_v16 = vsel %vm38_vm3, %v39_v10, %v37_v14 }
  0x27   :  { %v42_v17 = vadd.f32 %v40_v16, %v22_v1 }
  0x28   :  { %70 = vlog2.f32 %v41_v15 }
  0x29   :  { %72 = vlog2.f32 %v42_v17 }
  0x32   :  { %v71_v18 = vpop.eup %70 }
  0x33   :  { %v73_v19 = vpop.eup %72  ;;  %v44_v20 = vmul.f32 0.6931472, %v71_v18 }
  0x34   :  { %v46_v21 = vmul.f32 0.6931472, %v73_v19 }
  0x35   :  { %47 = vst [vmem:[#allocation5] sm:$0xff] %v44_v20 }
  0x36   :  { %48 = vst [vmem:[#allocation5 + $0x8] sm:$0xff] %v46_v21 }
  0x37   :  { %107 = shalt.err (!%p104_p12)
}
  0x38   :  { %s108_s22 = scalar_lea.hbm %s159_s1, 256 }
  0x39   :  { %p109_p13 = scmp.ne.s32.totalorder %s159_s1, %s108_s22  ;;  %p112_p0 = scmp.lt.u32.totalorder %s108_s22, %s159_s1 }
  0x3b   :  { %p114_p1 = pnand %p112_p0, %p109_p13 }
  0x3d   :  { %117 = shalt.err (!%p114_p1)
}
  0x3e   :  { %58 = dma.vmem_to_hbm [thread:$0]  %s56_s18, 256, %s159_s1, [#allocation4]  }
  0x3f   :  { %120 = dma.done.wait [#allocation4], 256  }
  0x40   :  { %121 = vsyncadd [#allocation4], 4294967040 }
  0x41   :  { %62 = vsyncpa [#allocation3], 1 }
  0x42   :  { %63 = vsyncpa [#allocation4], 1 }

</bundles_post_ra>
